<compile_context>
chip_gen: v7x
topology: tpu7x:2x2x1
jax: 0.10.0
libtpu: 0.0.40
codegen_flags: <defaults>
</compile_context>

<pallas_src>
import numpy as np
import jax
import jax.numpy as jnp
from jax.experimental import pallas as pl
from jax.experimental.pallas import tpu as pltpu

# Small synthetic config, consistent with the module's cfg keys.
CFG = dict(fs=8000, win_len=128, hop_len=64, n_fft=128, n_mels=32,
           overlap=0.5, n_frames=8, arch="grafp", dur=0.064,
           pitch_shift=2, min_rate=0.8, max_rate=1.2,
           time_mask=8, freq_mask=8)

_LANE = 128
_SUBL = 16                                   # sublane alignment for frame tiles (bf16-friendly)
_DB_SCALE = np.float32(10.0 / np.log(10.0))  # 10*log10(x) == (10/ln10)*ln(x)


def _round_up(x, m):
    return ((x + m - 1) // m) * m


# ---------------------------------------------------------------------------
# deterministic parameter construction (window, DFT matrices, mel filterbank)
# ---------------------------------------------------------------------------
def hann_window(win_len):
    # torch.hann_window(periodic=True)
    n = np.arange(win_len)
    return (0.5 * (1.0 - np.cos(2.0 * np.pi * n / win_len))).astype(np.float32)


def dft_matrices(n_fft):
    # real / (negated) imag parts of the rFFT as (n_fft, n_freq) matmul operands
    n_freq = n_fft // 2 + 1
    n = np.arange(n_fft)[:, None].astype(np.float64)
    k = np.arange(n_freq)[None, :].astype(np.float64)
    ang = 2.0 * np.pi * n * k / n_fft
    return np.cos(ang).astype(np.float32), (-np.sin(ang)).astype(np.float32)


def mel_fbanks(n_freq, f_min, f_max, n_mels, sample_rate):
    # torchaudio.functional.melscale_fbanks, mel_scale='htk', norm=None
    all_freqs = np.linspace(0.0, sample_rate / 2, n_freq)

    def hz2mel(f):
        return 2595.0 * np.log10(1.0 + f / 700.0)

    def mel2hz(m):
        return 700.0 * (10.0 ** (m / 2595.0) - 1.0)

    m_pts = np.linspace(hz2mel(f_min), hz2mel(f_max), n_mels + 2)
    f_pts = mel2hz(m_pts)
    f_diff = f_pts[1:] - f_pts[:-1]                      # (n_mels+1,)
    slopes = f_pts[None, :] - all_freqs[:, None]          # (n_freq, n_mels+2)
    down = -slopes[:, :-2] / f_diff[:-1]
    up = slopes[:, 2:] / f_diff[1:]
    fb = np.maximum(0.0, np.minimum(down, up))            # (n_freq, n_mels)
    return fb.astype(np.float32)


def build_logmel_params(cfg):
    """Fused, lane-packed, window-folded operands for the Pallas kernel.

    Returns:
      dftw : (n_fft, n_pack_pad)  [hann*cos(k=0..n_fft/2) | hann*(-sin)(k=1..n_fft/2-1)]
             (sin columns at k=0 and k=n_fft/2 are identically zero, so they are dropped;
              for n_fft=128 the packed width is exactly 128 lanes)
      fb2  : (n_pack_pad, n_mels_pad)  mel filterbank rows duplicated to match the packing,
             so  (reim*reim) @ fb2  ==  (re^2 + im^2) @ fb   exactly.
    """
    n_fft = cfg["n_fft"]
    n_mels = cfg["n_mels"]
    n_freq = n_fft // 2 + 1
    n_pack = 2 * n_freq - 2                 # == n_fft for even n_fft
    n_pack_pad = _round_up(n_pack, _LANE)
    n_mels_pad = _round_up(n_mels, _LANE)

    # TODO(synk): handle win_len < n_fft (torch centers/pads the window); here win_len == n_fft.
    assert cfg["win_len"] == n_fft
    win = hann_window(cfg["win_len"])
    cosm, sinm = dft_matrices(n_fft)        # sinm is already -sin

    dftw = np.zeros((n_fft, n_pack_pad), np.float32)
    dftw[:, :n_freq] = win[:, None] * cosm
    dftw[:, n_freq:n_pack] = win[:, None] * sinm[:, 1:n_freq - 1]

    fb = mel_fbanks(n_freq, 0.0, cfg["fs"] / 2, n_mels, cfg["fs"])
    fb2 = np.zeros((n_pack_pad, n_mels_pad), np.float32)
    fb2[:n_freq, :n_mels] = fb
    fb2[n_freq:n_pack, :n_mels] = fb[1:n_freq - 1]
    return jnp.asarray(dftw), jnp.asarray(fb2)


# ---------------------------------------------------------------------------
# Pallas kernel: fused windowed-DFT -> power -> mel -> dB on a flat frame tile
# ---------------------------------------------------------------------------
def _pick_tile(total, tile_frames):
    """Sublane-aligned frame tile; keep >= 2 grid steps when possible (v7x megacore)."""
    aligned = max(_SUBL, _round_up(total, _SUBL))
    tf = min(_round_up(tile_frames, _SUBL), aligned)
    if aligned >= 2 * _SUBL and -(-aligned // tf) < 2:
        tf = _round_up(aligned // 2, _SUBL)
    return tf


def _logmel_flat(flat, dftw, fb2, tile_frames):
    """(N, n_fft) frames -> (N, n_mels_pad) log-mel dB via one pipelined pallas_call."""
    total, n_fft = flat.shape
    n_pack_pad = dftw.shape[1]
    n_mels_pad = fb2.shape[1]

    tf = _pick_tile(total, tile_frames)
    total_pad = _round_up(total, tf)
    if total_pad != total:
        flat = jnp.pad(flat, ((0, total_pad - total), (0, 0)))

    # in-kernel sub-tile: keeps the (sub, 128) f32 reim/power intermediates small
    sub = tf
    for cand in (256, 128, 64, 32):
        if tf % cand == 0:
            sub = cand
            break
    n_sub = tf // sub
    unroll = n_sub <= 8

    def kernel(frames_ref, dftw_ref, fb2_ref, out_ref):
        dw = dftw_ref[...]
        fb = fb2_ref[...]

        def body(i, carry):
            r0 = pl.multiple_of(i * sub, sub)
            fr = frames_ref[pl.ds(r0, sub), :]
            # MXU matmul 1: windowed DFT (packed re|im), f32 accumulation
            reim = jnp.dot(fr, dw, preferred_element_type=jnp.float32)
            # power spectrum (VPU), then MXU matmul 2: mel filterbank (duplicated rows)
            p = (reim * reim).astype(fb.dtype)
            mel = jnp.dot(p, fb, preferred_element_type=jnp.float32)
            # AmplitudeToDB (stype='power', ref=1.0, amin=1e-10, top_db=None)
            out_ref[pl.ds(r0, sub), :] = _DB_SCALE * jnp.log(jnp.maximum(mel, 1e-10))
            return carry

        jax.lax.fori_loop(0, n_sub, body, 0, unroll=unroll)

    out = pl.pallas_call(
        kernel,
        out_shape=jax.ShapeDtypeStruct((total_pad, n_mels_pad), jnp.float32),
        grid_spec=pltpu.PrefetchScalarGridSpec(
            num_scalar_prefetch=0,
            grid=(total_pad // tf,),
            in_specs=[
                pl.BlockSpec((tf, n_fft), lambda t: (t, 0)),
                # constant index_map -> operand fetched once, never re-DMA'd across the grid
                pl.BlockSpec((n_fft, n_pack_pad), lambda t: (0, 0)),
                pl.BlockSpec((n_pack_pad, n_mels_pad), lambda t: (0, 0)),
            ],
            out_specs=pl.BlockSpec((tf, n_mels_pad), lambda t: (t, 0)),
        ),
        compiler_params=pltpu.CompilerParams(
            dimension_semantics=("parallel",),
            vmem_limit_bytes=32 * 1024 * 1024),   # v5e scoped default is only 16 MiB
    )(flat, dftw, fb2)
    return out[:total]


def logmelspec_db(x, dftw, fb2, cfg, compute_dtype=jnp.bfloat16, tile_frames=1024):
    """nn.Sequential(MelSpectrogram(...), AmplitudeToDB()) on (B, T) waveforms -> (B, n_mels, F)."""
    n_fft = cfg["n_fft"]
    hop = cfg["hop_len"]
    n_mels = cfg["n_mels"]
    # 50% overlap -> frames split into even/odd NON-overlapping contiguous views (no HBM gather).
    assert 2 * hop == n_fft, "even/odd frame decomposition assumes hop == n_fft/2"

    B, T = x.shape
    pad = n_fft // 2
    xp = jnp.pad(x, ((0, 0), (pad, pad)), mode="reflect")        # center=True reflect padding
    n_frames = 1 + T // hop
    n_even = (n_frames + 1) // 2
    n_odd = n_frames // 2

    ev = xp[:, :n_even * n_fft].reshape(B * n_even, n_fft).astype(compute_dtype)
    od = xp[:, hop:hop + n_odd * n_fft].reshape(B * n_odd, n_fft).astype(compute_dtype)

    dftw_c = dftw.astype(compute_dtype)
    fb2_c = fb2.astype(compute_dtype)

    mel_ev = _logmel_flat(ev, dftw_c, fb2_c, tile_frames)[:, :n_mels].reshape(B, n_even, n_mels)
    mel_od = _logmel_flat(od, dftw_c, fb2_c, tile_frames)[:, :n_mels].reshape(B, n_odd, n_mels)

    out = jnp.zeros((B, n_frames, n_mels), jnp.float32)
    out = out.at[:, 0::2, :].set(mel_ev).at[:, 1::2, :].set(mel_od)
    return jnp.transpose(out, (0, 2, 1))                          # (B, n_mels, n_frames)


def gpu_transform_neuralfp_forward(x_i, x_j, dftw, fb2, cfg, train=True,
                                   compute_dtype=jnp.bfloat16):
    """JAX equivalent of GPUTransformNeuralfp.forward on the GPU/TPU path."""
    if train:
        # one fused pipeline for both views: concat on batch, split afterwards
        B = x_i.shape[0]
        X = logmelspec_db(jnp.concatenate([x_i, x_j], axis=0), dftw, fb2, cfg, compute_dtype)
        return X[:B], X[B:]
    X_i = logmelspec_db(x_i, dftw, fb2, cfg, compute_dtype)
    # TODO(synk): eval path unfold into overlapping n_frames windows is pure indexing glue on
    # top of this output; not exercised here.
    return X_i, None


# ---------------------------------------------------------------------------
# pure-JAX references for correctness checks
# ---------------------------------------------------------------------------
def _frame_signal_ref(x, n_fft, hop):
    """reference-only framing via gather: (B, T) -> (B, n_frames, n_fft)."""
    B, T = x.shape
    pad = n_fft // 2
    xp = jnp.pad(x, ((0, 0), (pad, pad)), mode="reflect")
    n_frames = 1 + T // hop
    idx = np.arange(n_frames)[:, None] * hop + np.arange(n_fft)[None, :]
    return xp[:, idx], n_frames


def _ref_logmel(x, win, cosm, sinm, fb, cfg):
    """unfused torchaudio-style math, HIGHEST precision f32."""
    frames, _ = _frame_signal_ref(x, cfg["n_fft"], cfg["hop_len"])
    w = frames * win[None, None, :]
    hp = jax.lax.Precision.HIGHEST
    re = jnp.einsum("bfn,nk->bfk", w, cosm, precision=hp)
    im = jnp.einsum("bfn,nk->bfk", w, sinm, precision=hp)
    power = re * re + im * im
    mel = jnp.einsum("bfk,km->bfm", power, fb, precision=hp)
    db = 10.0 * jnp.log10(jnp.maximum(mel, 1e-10))
    return jnp.transpose(db, (0, 2, 1))


def _ref_logmel_packed(x, dftw, fb2, cfg, compute_dtype):
    """same packed operands and the same dtype casts as the kernel (quantization-matched)."""
    frames, _ = _frame_signal_ref(x, cfg["n_fft"], cfg["hop_len"])
    fr = frames.astype(compute_dtype)
    dw = dftw.astype(compute_dtype)
    fb = fb2.astype(compute_dtype)
    reim = jnp.einsum("bfn,nk->bfk", fr, dw, preferred_element_type=jnp.float32)
    p = (reim * reim).astype(compute_dtype)
    mel = jnp.einsum("bfk,km->bfm", p, fb, preferred_element_type=jnp.float32)
    db = _DB_SCALE * jnp.log(jnp.maximum(mel, 1e-10))
    return jnp.transpose(db[..., :cfg["n_mels"]], (0, 2, 1))


if __name__ == "__main__":
    cfg = CFG
    n_fft = cfg["n_fft"]
    n_freq = n_fft // 2 + 1

    dftw, fb2 = build_logmel_params(cfg)

    # deterministic small inputs: two batches of 512-sample waveforms
    key = jax.random.PRNGKey(0)
    k1, k2 = jax.random.split(key)
    x_i = jax.random.normal(k1, (2, 512), dtype=jnp.float32)
    x_j = jax.random.normal(k2, (2, 512), dtype=jnp.float32)

    # default (bf16 MXU inputs) forward
    X_i, X_j = gpu_transform_neuralfp_forward(x_i, x_j, dftw, fb2, cfg, train=True)
    X_i = jax.block_until_ready(X_i)
    X_j = jax.block_until_ready(X_j)

    n_frames = 1 + 512 // cfg["hop_len"]
    assert X_i.shape == (2, cfg["n_mels"], n_frames)
    assert X_j.shape == X_i.shape

    # (1) bf16 kernel vs quantization-matched packed reference (validates the Pallas kernel)
    ref_i_bf = _ref_logmel_packed(x_i, dftw, fb2, cfg, jnp.bfloat16)
    ref_j_bf = _ref_logmel_packed(x_j, dftw, fb2, cfg, jnp.bfloat16)
    np.testing.assert_allclose(np.asarray(X_i), np.asarray(ref_i_bf), rtol=1e-3, atol=2e-2)
    np.testing.assert_allclose(np.asarray(X_j), np.asarray(ref_j_bf), rtol=1e-3, atol=2e-2)

    # (2) f32 kernel vs unfused HIGHEST-precision reference (validates packing / fusion math)
    X_i32 = jax.block_until_ready(
        logmelspec_db(x_i, dftw, fb2, cfg, compute_dtype=jnp.float32))
    win = jnp.asarray(hann_window(cfg["win_len"]))
    cosm_np, sinm_np = dft_matrices(n_fft)
    fb = jnp.asarray(mel_fbanks(n_freq, 0.0, cfg["fs"] / 2, cfg["n_mels"], cfg["fs"]))
    ref_i32 = _ref_logmel(x_i, win, jnp.asarray(cosm_np), jnp.asarray(sinm_np), fb, cfg)
    np.testing.assert_allclose(np.asarray(X_i32), np.asarray(ref_i32), rtol=1e-3, atol=2e-2)

    print("KERNEL_OK")
</pallas_src>

<mosaic_0001>
module attributes {stable_mosaic.version = 11 : i64} {
  func.func @kernel(%arg0: i32, %arg1: memref<16x128xbf16, #tpu.memory_space<vmem>>, %arg2: memref<128x128xbf16, #tpu.memory_space<vmem>>, %arg3: memref<128x128xbf16, #tpu.memory_space<vmem>>, %arg4: memref<16x128xf32, #tpu.memory_space<vmem>>) attributes {dimension_semantics = [#tpu.dimension_semantics<parallel>], iteration_bounds = array<i64: 2>, scalar_prefetch = 0 : i64, scratch_operands = 0 : i64, tpu.core_type = #tpu.core_type<tc>, window_params = [{transform_indices = @transform_0, window_bounds = array<i64: 16, 128>}, {pipeline_mode = #tpu.pipeline_mode<synchronous>, transform_indices = @transform_1, window_bounds = array<i64: 128, 128>}, {pipeline_mode = #tpu.pipeline_mode<synchronous>, transform_indices = @transform_2, window_bounds = array<i64: 128, 128>}, {transform_indices = @transform_3, window_bounds = array<i64: 16, 128>}]} {
    %c0 = arith.constant 0 : index
    %c0_0 = arith.constant 0 : index
    %0 = vector.load %arg2[%c0, %c0_0] : memref<128x128xbf16, #tpu.memory_space<vmem>>, vector<128x128xbf16>
    %c0_1 = arith.constant 0 : index
    %c0_2 = arith.constant 0 : index
    %1 = vector.load %arg3[%c0_1, %c0_2] : memref<128x128xbf16, #tpu.memory_space<vmem>>, vector<128x128xbf16>
    %c0_i32 = arith.constant 0 : i32
    %c16_i32 = arith.constant 16 : i32
    %2 = arith.muli %c0_i32, %c16_i32 : i32
    %3 = tpu.assume_multiple %2, 16 : i32
    %4 = arith.index_cast %3 : i32 to index
    %c0_3 = arith.constant 0 : index
    %5 = vector.load %arg1[%4, %c0_3] : memref<16x128xbf16, #tpu.memory_space<vmem>>, vector<16x128xbf16>
    %cst = arith.constant dense<0.000000e+00> : vector<16x128xf32>
    %6 = tpu.matmul %5, %0, %cst {dimension_numbers = #tpu.dot_dimension_numbers<[1], [0], [0], [1], [0, 0, 1, 1], [], []>} : vector<16x128xbf16>, vector<128x128xbf16>, vector<16x128xf32> -> vector<16x128xf32>
    %7 = arith.mulf %6, %6 : vector<16x128xf32>
    %8 = arith.truncf %7 : vector<16x128xf32> to vector<16x128xbf16>
    %cst_4 = arith.constant dense<0.000000e+00> : vector<16x128xf32>
    %9 = tpu.matmul %8, %1, %cst_4 {dimension_numbers = #tpu.dot_dimension_numbers<[1], [0], [0], [1], [0, 0, 1, 1], [], []>} : vector<16x128xbf16>, vector<128x128xbf16>, vector<16x128xf32> -> vector<16x128xf32>
    %cst_5 = arith.constant 1.000000e-10 : f32
    %10 = vector.broadcast %cst_5 : f32 to vector<16x128xf32>
    %11 = arith.maximumf %9, %10 : vector<16x128xf32>
    %12 = math.log %11 : vector<16x128xf32>
    %cst_6 = arith.constant 4.34294462 : f32
    %13 = vector.broadcast %cst_6 : f32 to vector<16x128xf32>
    %14 = arith.mulf %13, %12 : vector<16x128xf32>
    %15 = arith.index_cast %3 : i32 to index
    %c0_7 = arith.constant 0 : index
    %16 = vector.load %arg4[%15, %c0_7] : memref<16x128xf32, #tpu.memory_space<vmem>>, vector<16x128xf32>
    tpu.vector_store %arg4[%15, %c0_7], %14 {strides = array<i32>} : memref<16x128xf32, #tpu.memory_space<vmem>>, vector<16x128xf32>,
    %c1_i32 = arith.constant 1 : i32
    return
  }
  func.func @transform_0(%arg0: i32) -> (i32, i32) {
    %c0_i32 = arith.constant 0 : i32
    %c0_i32_0 = arith.constant 0 : i32
    return %arg0, %c0_i32 : i32, i32
  }
  func.func @transform_1(%arg0: i32) -> (i32, i32) {
    %c0_i32 = arith.constant 0 : i32
    %c0_i32_0 = arith.constant 0 : i32
    %c0_i32_1 = arith.constant 0 : i32
    return %c0_i32, %c0_i32_0 : i32, i32
  }
  func.func @transform_2(%arg0: i32) -> (i32, i32) {
    %c0_i32 = arith.constant 0 : i32
    %c0_i32_0 = arith.constant 0 : i32
    %c0_i32_1 = arith.constant 0 : i32
    return %c0_i32, %c0_i32_0 : i32, i32
  }
  func.func @transform_3(%arg0: i32) -> (i32, i32) {
    %c0_i32 = arith.constant 0 : i32
    %c0_i32_0 = arith.constant 0 : i32
    return %arg0, %c0_i32 : i32, i32
  }
}

</mosaic_0001>

<bundles_post_ra>
// kernel: tpu_custom_call.1
= control target key start
LH: loop header
LB: loop body
LE: loop exit
PB: predicated region body
PF: predicated region fallthrough
CT: control target
= control target key end

     0   :  { %8 = vsyncpa [#allocation3], 0  ;;  %s1182_s0 = inlined_call_operand.hbm [shape: bf16[32,128], index: 0, kind: input, shape index: {}]   ;;  %s1183_s1 = inlined_call_operand.hbm [shape: bf16[128,128], index: 1, kind: input, shape index: {}]   ;;  %s1184_s2 = inlined_call_operand.hbm [shape: bf16[128,128], index: 2, kind: input, shape index: {}]   ;;  %s1185_s3 = inlined_call_operand.hbm [shape: f32[32,128], index: 3, kind: output, shape index: {}]  }
   0x1   :  { %10 = vsyncpa [#allocation3 + $0x1], 0 }
   0x2   :  { %11 = vsyncpa [#allocation6], 0 }
   0x3   :  { %12 = vsyncpa [#allocation4], 0 }
   0x4   :  { %14 = vsyncpa [#allocation4 + $0x1], 0  ;;  %s935_s12 = smov 0   ;;  %s937_s13 = smov 0  }
   0x5   :  { %s939_s14 = smov 0   ;;  %s941_s15 = smov 0  }
   0x6 LB: > { %s956_s16 = sadd.s32 4294967295, %s903_s15   ;;  %s558_s17 = sadd.s32 4294967294, %s903_s15   ;;  %s903_s15 = sphi %s941_s15, %s1205_s15   ;;  %s899_s14 = sphi %s939_s14, %s1204_s14   ;;  %s895_s13 = sphi %s937_s13, %s1203_s13   ;;  %s891_s12 = sphi %s935_s12, %s1202_s12  }
   0x7   : > { %p40_p0 = scmp.ne.s32.totalorder %s895_s13, %s891_s12  ;;  %p1186_p1 = scmp.eq.s32.totalorder %s956_s16, 0 }
   0x8   : > { %p112_p3 = scmp.eq.s32.totalorder %s558_s17, 1  ;;  %p559_p5 = scmp.ge.s32.totalorder %s903_s15, 1 }
   0x9   : > { %p965_p4 = por %p1186_p1, %p40_p0  ;;  %p119_p7 = scmp.lt.s32.totalorder %s903_s15, 3 }
   0xa   : > { %p970_p6 = por %p112_p3, %p40_p0  ;;  %s905_s21 = smov [#allocation5]  }
   0xb   : > { %s1189_s18 = scalar_select %p965_p4, 1, 0 }
   0xc   : > { %s1190_s19 = scalar_select %p970_p6, 1, 0 }
   0xd   : > { %p975_p8 = pnand %p559_p5, %p119_p7  ;;  %s131_s22 = sshll.u32 %s905_s21, 4  ;;  %s979_s22 = int_to_ptr.vmem [resolvable:$true] %s131_s22 }
   0xe   : > { %s906_s24 = smov [#allocation7]   ;;  %s747_s28 = scalar_lea.hbm %s1183_s1, 1024 }
   0xf   : > { %p665_p9 = pneg %p975_p8  ;;  %s144_s25 = sshll.u32 %s906_s24, 4  ;;  %s990_s25 = int_to_ptr.vmem [resolvable:$true] %s144_s25 }
  0x10   : > { %p748_p12 = scmp.ne.s32.totalorder %s1183_s1, %s747_s28  ;;  %p754_p5 = scmp.lt.u32.totalorder %s747_s28, %s1183_s1 }
  0x11   : > { %p986_p11 = pnand %p665_p9, %p1186_p1 }
  0x13   : > { %p749_p13 = pneg %p986_p11 }
  0x15   : > { %p750_p0 = pnand %p749_p13, %p748_p12 }
  0x17   : > { %p751_p3 = pneg %p750_p0 }
  0x19   : > { %p756_p7 = pnand %p754_p5, %p751_p3 }
  0x1b   : > { %759 = shalt.err (!%p756_p7)
}
  0x1c   : > { %s760_s6 = scalar_lea.vmem %s979_s22, 1024  ;;  %p768_p2 = scmp.lt.s32.totalorder %s979_s22, %s979_s22 }
  0x1d   : > { %p761_p9 = scmp.ne.s32.totalorder %s979_s22, %s760_s6  ;;  %p769_p12 = scmp.lt.s32.totalorder %s760_s6, %s760_s6 }
  0x1f   : > { %p763_p10 = pnand %p761_p9, %p749_p13  ;;  %p770_p0 = por %p769_p12, %p768_p2 }
  0x21   : > { %p764_p1 = pneg %p763_p10 }
  0x23   : > { %p771_p6 = pnand %p770_p0, %p764_p1 }
  0x25   : > { %774 = shalt.err (!%p771_p6)
}
  0x26   : > { %s907_s7 = smov 64   ;;  %s908_s8 = smov 4  }
  0x27   : > { %668 = dma.hbm_to_vmem [thread:$0]  (!%p986_p11), %s1183_s1, 1024, %s979_s22, [#allocation6], %s907_s7, %s907_s7, %s908_s8  }
  0x28   : > { %s775_s21 = scalar_lea.hbm %s1184_s2, 1024 }
  0x29   : > { %p776_p1 = scmp.ne.s32.totalorder %s1184_s2, %s775_s21  ;;  %p782_p10 = scmp.lt.u32.totalorder %s775_s21, %s1184_s2 }
  0x2b   : > { %p778_p2 = pnand %p776_p1, %p749_p13 }
  0x2d   : > { %p779_p6 = pneg %p778_p2 }
  0x2f   : > { %p784_p3 = pnand %p782_p10, %p779_p6 }
  0x31   : > { %787 = shalt.err (!%p784_p3)
}
  0x32   : > { %s788_s22 = scalar_lea.vmem %s990_s25, 1024  ;;  %p796_p12 = scmp.lt.s32.totalorder %s990_s25, %s990_s25 }
  0x33   : > { %p789_p5 = scmp.ne.s32.totalorder %s990_s25, %s788_s22  ;;  %p797_p0 = scmp.lt.s32.totalorder %s788_s22, %s788_s22 }
  0x35   : > { %p791_p7 = pnand %p789_p5, %p749_p13  ;;  %p798_p1 = por %p797_p0, %p796_p12 }
  0x37   : > { %p792_p9 = pneg %p791_p7 }
  0x39   : > { %p799_p2 = pnand %p798_p1, %p792_p9 }
  0x3b   : > { %802 = shalt.err (!%p799_p2)
}
  0x3c   : > { %671 = dma.hbm_to_vmem [thread:$0]  (!%p986_p11), %s1184_s2, 1024, %s990_s25, [#allocation6], %s907_s7, %s907_s7, %s908_s8  }
  0x3d   : > { %s1051_s23 = sadd.s32 1, %s903_s15   ;;  %s27_s4 = sadd.s32 1, %s899_s14 }
  0x3e   : > { %s24_s5 = ssub.s32 %s903_s15, %s1051_s23  ;;  %p34_p13 = scmp.ne.s32.totalorder %s899_s14, %s895_s13 }
  0x3f   : > { %p25_p6 = scmp.eq.s32.totalorder %s24_s5, 0  ;;  %p35_p10 = scmp.eq.s32.totalorder %s903_s15, 0 }
  0x40   : > { %p1193_p3 = scmp.eq.s32.totalorder %s956_s16, 1  ;;  %p682_p7 = scmp.lt.s32.totalorder %s903_s15, 2 }
  0x41   : > { %s1067_s9 = scalar_select %p25_p6, %s899_s14, %s27_s4  }
  0x42   : > { %p1061_p5 = por %p1193_p3, %p34_p13  ;;  %p36_p9 = por %p35_p10, %p34_p13 }
  0x43   : > { %s158_s10 = sand.u32 1, %s899_s14   ;;  %s593_s25 = sshll.u32 %s903_s15, 7 }
  0x44   : > { %s1194_s6 = scalar_select %p1061_p5, 1, 0 }
  0x45   : > { %s563_s11 = sshll.u32 %s158_s10, 3  ;;  %s1074_s24 = scalar_lea.hbm %s1182_s0, %s593_s25 }
  0x46   : > { %s162_s26 = scalar_lea.vmem [#allocation2], %s563_s11  ;;  %p1078_p11 = pnand %p682_p7, %p36_p9 }
  0x47   : > { %s169_s27 = sshll.u32 %s162_s26, 4  ;;  %s1082_s22 = scalar_lea.sflag [#allocation3], %s158_s10  ;;  %s1076_s27 = int_to_ptr.vmem [resolvable:$true] %s169_s27 }
  0x48   : > { %s803_s29 = scalar_lea.hbm %s1074_s24, 128  ;;  %p805_p0 = pneg %p1078_p11 }
  0x49   : > { %p804_p12 = scmp.ne.s32.totalorder %s1074_s24, %s803_s29  ;;  %s808_s5 = scalar_lea.hbm %s1182_s0, 256 }
  0x4a   : > { %p809_p13 = scmp.lt.u32.totalorder %s1074_s24, %s1182_s0  ;;  %p810_p6 = scmp.lt.u32.totalorder %s808_s5, %s803_s29 }
  0x4b   : > { %p806_p1 = pnand %p805_p0, %p804_p12  ;;  %p812_p3 = scmp.lt.u32.totalorder %s803_s29, %s1074_s24 }
  0x4c   : > { %p811_p10 = por %p810_p6, %p809_p13 }
  0x4d   : > { %p807_p2 = pneg %p806_p1 }
  0x4e   : > { %p813_p7 = por %p812_p3, %p811_p10 }
  0x50   : > { %p814_p9 = pnand %p813_p7, %p807_p2 }
  0x52   : > { %817 = shalt.err (!%p814_p9)
}
  0x53   : > { %s818_s10 = scalar_lea.vmem %s1076_s27, 128  ;;  %s909_s17 = smov [#allocation2]  }
  0x54   : > { %p819_p12 = scmp.ne.s32.totalorder %s1076_s27, %s818_s10  ;;  %s823_s21 = sshll.u32 %s909_s17, 4  ;;  %s824_s21 = int_to_ptr.vmem [resolvable:$false] %s823_s21 }
  0x55   : > { %s825_s26 = scalar_lea.vmem %s824_s21, 256  ;;  %p826_p4 = scmp.lt.s32.totalorder %s1076_s27, %s824_s21 }
  0x56   : > { %p821_p1 = pnand %p819_p12, %p805_p0  ;;  %p827_p13 = scmp.lt.s32.totalorder %s825_s26, %s818_s10 }
  0x58   : > { %p822_p5 = pneg %p821_p1  ;;  %p828_p6 = por %p827_p13, %p826_p4 }
  0x5a   : > { %p829_p10 = pnand %p828_p6, %p822_p5 }
  0x5c   : > { %832 = shalt.err (!%p829_p10)
}
  0x5d   : > { %675 = dma.hbm_to_vmem [thread:$0]  (!%p1078_p11), %s1074_s24, 128, %s1076_s27, %s1082_s22, %s907_s7, %s907_s7, %s908_s8  }
  0x5e   : > { %181 = sbr.rel (%p975_p8) target bundleno = 603 (0x25b), region = 32  ;;  %s1116_s29 = sand.u32 (!%p975_p8), 1, %s895_s13  }
  0x5f   : > { %s567_s30 = sshll.u32 (!%p975_p8), %s1116_s29, 3  ;;  %s184_s4 = scalar_lea.sflag (!%p975_p8), [#allocation3], %s1116_s29 }
  0x60   : > { %s1120_s5 = scalar_lea.vmem (!%p975_p8), [#allocation2], %s567_s30  ;;  %p1196_p4 = scmp.ne.s32.totalorder (!%p975_p8), %s1189_s18, 0 }
  0x65   : > { %878 = dma.done.wait (%p1196_p4), %s184_s4, 128  }
  0x66   : > { %880 = vsyncadd (%p1196_p4), %s184_s4, 4294967168  ;;  %p1197_p5 = scmp.eq.s32.totalorder %s956_s16, 0 }
  0x68   : > { %882 = dma.done.wait (%p1197_p5), [#allocation6], 2048   ;;  %p1198_p8 = pmov %p1197_p5 }
  0x69   : > { %v910_v0 = vmov 0.0   ;;  %vm911_vm0 = vmmov 0   ;;  %v726_v1 = vld [vmem:[#allocation5] sm:$0xff]   ;;  %v727_v2 = vld [vmem:[#allocation5 + $0x8] sm:$0xff]   ;;  %v728_v3 = vld [vmem:[#allocation5 + $0x10] sm:$0xff]   ;;  %s570_s18 = sshll.u32 %s1116_s29, 4 }
  0x6a   : > { %884 = vsyncadd (%p1198_p8), [#allocation6], 4294965248  ;;  %613 = vmatprep.subr.bf16.mxu0 %v910_v0  ;;  %629 = vmatprep.mubr.msk.bf16.mxu0 %vm911_vm0, %v910_v0  ;;  %v735_v4 = vld [vmem:[#allocation7] sm:$0xff]   ;;  %v729_v5 = vld [vmem:[#allocation5 + $0x18] sm:$0xff]   ;;  %s217_s20 = scalar_lea.vmem [#allocation8], %s570_s18  ;;  %s594_s8 = sshll.u32 %s956_s16, 8 }
  0x6b   : > { %633 = vmatprep.subr.bf16.mxu1 %v910_v0  ;;  %649 = vmatprep.mubr.msk.bf16.mxu1 %vm911_vm0, %v910_v0  ;;  %v736_v6 = vld [vmem:[#allocation7 + $0x8] sm:$0xff]   ;;  %v730_v7 = vld [vmem:[#allocation5 + $0x20] sm:$0xff]   ;;  %v737_v8 = vld [vmem:[#allocation7 + $0x10] sm:$0xff]   ;;  %s466_s7 = sshll.u32 %s217_s20, 4  ;;  %s1138_s28 = scalar_lea.hbm %s1185_s3, %s594_s8  ;;  %s1133_s7 = int_to_ptr.vmem [resolvable:$true] %s466_s7 }
  0x6c   : > { %614 = vmatpush3.bf16.msra.mxu0 %v726_v1  ;;  %634 = vmatpush3.bf16.msra.mxu1 %v735_v4  ;;  %v731_v9 = vld [vmem:[#allocation5 + $0x28] sm:$0xff]   ;;  %v738_v10 = vld [vmem:[#allocation7 + $0x18] sm:$0xff]   ;;  %v732_v11 = vld [vmem:[#allocation5 + $0x30] sm:$0xff]   ;;  %s453_s22 = scalar_lea.sflag [#allocation4], %s1116_s29  ;;  %s833_s11 = scalar_lea.vmem %s1133_s7, 256 }
  0x6d   : > { %615 = vmatprep.subr.bf16.mxu0 %v910_v0  ;;  %635 = vmatprep.subr.bf16.mxu1 %v910_v0  ;;  %v739_v12 = vld [vmem:[#allocation7 + $0x20] sm:$0xff]   ;;  %v733_v13 = vld [vmem:[#allocation5 + $0x38] sm:$0xff]   ;;  %v740_v14 = vld [vmem:[#allocation7 + $0x28] sm:$0xff]   ;;  %p834_p11 = scmp.ne.s32.totalorder %s1133_s7, %s833_s11  ;;  %p1199_p0 = scmp.ne.s32.totalorder %s1194_s6, 0 }
  0x6e   : > { %v734_v15 = vld [vmem:[%s1120_s5] sm:$0xff]   ;;  %s912_s16 = smov [#allocation8]  }
  0x6f   : > { %v741_v16 = vld [vmem:[#allocation7 + $0x30] sm:$0xff]   ;;  %v742_v17 = vld [vmem:[#allocation7 + $0x38] sm:$0xff]   ;;  %p835_p2 = pnand %p834_p11, %p1199_p0  ;;  %s837_s25 = sshll.u32 %s912_s16, 4  ;;  %s838_s25 = int_to_ptr.vmem [resolvable:$false] %s837_s25 }
  0x70   : > { %616 = vmatpush3.bf16.msra.mxu0 %v727_v2  ;;  %636 = vmatpush3.bf16.msra.mxu1 %v736_v6  ;;  %s839_s10 = scalar_lea.vmem %s838_s25, 512  ;;  %p840_p7 = scmp.lt.s32.totalorder %s1133_s7, %s838_s25 }
  0x71   : > { %617 = vmatprep.subr.bf16.mxu0 %v910_v0  ;;  %637 = vmatprep.subr.bf16.mxu1 %v910_v0  ;;  %p836_p3 = pneg %p835_p2  ;;  %p841_p9 = scmp.lt.s32.totalorder %s839_s10, %s833_s11 }
  0x73   : > { %p842_p12 = por %p841_p9, %p840_p7 }
  0x74   : > { %618 = vmatpush3.bf16.msra.mxu0 %v728_v3  ;;  %638 = vmatpush3.bf16.msra.mxu1 %v737_v8 }
  0x75   : > { %619 = vmatprep.subr.bf16.mxu0 %v910_v0  ;;  %639 = vmatprep.subr.bf16.mxu1 %v910_v0  ;;  %p843_p1 = pnand %p842_p12, %p836_p3 }
  0x78   : > { %620 = vmatpush3.bf16.msra.mxu0 %v729_v5  ;;  %640 = vmatpush3.bf16.msra.mxu1 %v738_v10 }
  0x79   : > { %621 = vmatprep.subr.bf16.mxu0 %v910_v0  ;;  %641 = vmatprep.subr.bf16.mxu1 %v910_v0 }
  0x7c   : > { %622 = vmatpush3.bf16.msra.mxu0 %v730_v7  ;;  %642 = vmatpush3.bf16.msra.mxu1 %v739_v12 }
  0x7d   : > { %623 = vmatprep.subr.bf16.mxu0 %v910_v0  ;;  %643 = vmatprep.subr.bf16.mxu1 %v910_v0 }
  0x80   : > { %624 = vmatpush3.bf16.msra.mxu0 %v731_v9  ;;  %644 = vmatpush3.bf16.msra.mxu1 %v740_v14 }
  0x81   : > { %625 = vmatprep.subr.bf16.mxu0 %v910_v0  ;;  %645 = vmatprep.subr.bf16.mxu1 %v910_v0 }
  0x84   : > { %626 = vmatpush3.bf16.msra.mxu0 %v732_v11  ;;  %646 = vmatpush3.bf16.msra.mxu1 %v741_v16 }
  0x85   : > { %627 = vmatprep.subr.bf16.mxu0 %v910_v0  ;;  %647 = vmatprep.subr.bf16.mxu1 %v910_v0 }
  0x88   : > { %628 = vmatpush3.bf16.msra.mxu0 %v733_v13  ;;  %648 = vmatpush3.bf16.msra.mxu1 %v742_v17 }
  0x8b   : > { %630 = vmatmul.mubr.bf16.vlgmr.msra.gmra.mrb[0].mxu0 %v734_v15 }
 0x15e   : > { %v343_v18 = vpop.f32.mrb[0].mxu0 }
 0x15f   : > { %v631_v19 = vpop.f32.mrb[1].mxu0  ;;  %v350_v21 = vmul.f32 %v343_v18, %v343_v18 }
 0x160   : > { %v346_v20 = vpop.f32.mrb[2].mxu0 }
 0x161   : > { %v351_v22 = vmul.f32 %v346_v20, %v346_v20  ;;  %v632_v23 = vpop.f32.mrb[3].mxu0 }
 0x163   : > { %v352_v24 = vpack.c.bf16 %v351_v22, %v350_v21 }
 0x165   : > { %650 = vmatmul.mubr.bf16.vlgmr.msra.gmra.mrb[0].mxu1 %v352_v24 }
 0x238   : > { %v435_v25 = vpop.f32.mrb[0].mxu1 }
 0x239   : > { %v442_v26 = vmax.f32 %v435_v25, 1e-10  ;;  %v651_v27 = vpop.f32.mrb[1].mxu1 }
 0x23a   : > { %v438_v28 = vpop.f32.mrb[2].mxu1 }
 0x23b   : > { %743 = vlog2.f32 %v442_v26  ;;  %v443_v29 = vmax.f32 %v438_v28, 1e-10  ;;  %v652_v30 = vpop.f32.mrb[3].mxu1 }
 0x23d   : > { %745 = vlog2.f32 %v443_v29 }
 0x245   : > { %v744_v31 = vpop.eup %743 }
 0x246   : > { %v445_v32 = vmul.f32 0.6931472, %v744_v31 }
 0x247   : > { %v746_v33 = vpop.eup %745 }
 0x248   : > { %v448_v34 = vmul.f32 4.3429446, %v445_v32  ;;  %v447_v35 = vmul.f32 0.6931472, %v746_v33 }
 0x24a   : > { %450 = vst [vmem:[%s217_s20] sm:$0xff] %v448_v34  ;;  %v449_v36 = vmul.f32 4.3429446, %v447_v35 }
 0x24c   : > { %451 = vst [vmem:[%s217_s20 + $0x8] sm:$0xff] %v449_v36 }
 0x24d   : > { %846 = shalt.err (!%p843_p1)
}
 0x24e   : > { %s847_s17 = scalar_lea.hbm %s1138_s28, 256  ;;  %s851_s30 = scalar_lea.hbm %s1185_s3, 512 }
 0x24f   : > { %p848_p13 = scmp.ne.s32.totalorder %s1138_s28, %s847_s17  ;;  %p852_p4 = scmp.lt.u32.totalorder %s1138_s28, %s1185_s3 }
 0x250   : > { %p853_p5 = scmp.lt.u32.totalorder %s851_s30, %s847_s17  ;;  %p855_p11 = scmp.lt.u32.totalorder %s847_s17, %s1138_s28 }
 0x251   : > { %p849_p6 = pnand %p848_p13, %p1199_p0 }
 0x252   : > { %p854_p8 = por %p853_p5, %p852_p4 }
 0x253   : > { %p850_p10 = pneg %p849_p6 }
 0x254   : > { %p856_p2 = por %p855_p11, %p854_p8 }
 0x256   : > { %p857_p3 = pnand %p856_p2, %p850_p10 }
 0x258   : > { %860 = shalt.err (!%p857_p3)
}
 0x259   : > { %s913_s18 = smov 128   ;;  %s914_s20 = smov 8  }
 0x25a   : > { %663 = dma.vmem_to_hbm [thread:$0]  (%p1199_p0), %s1133_s7, 256, %s1138_s28, %s453_s22, %s913_s18, %s913_s18, %s914_s20  }
 0x25b PF: > { %s481_s8 = sand.u32 1, %s891_s12   ;;  %p1200_p7 = scmp.ne.s32.totalorder %s1190_s19, 0 }
 0x25c   : > { %p1201_p9 = scmp.ge.s32.totalorder %s903_s15, 2  ;;  %s482_s24 = scalar_lea.sflag [#allocation4], %s481_s8 }
 0x25e   : > { %p677_p12 = pnand %p1201_p9, %p1200_p7 }
 0x260   : > { %886 = dma.done.wait (!%p677_p12), %s482_s24, 256  }
 0x261   : > { %888 = vsyncadd (!%p677_p12), %s482_s24, 4294967040  ;;  %p17_p1 = scmp.ge.s32.totalorder %s1051_s23, 4   ;;  %s1202_s12 = smov %s895_s13 }
 0x262   : > { %s1203_s13 = smov %s899_s14  ;;  %s1204_s14 = smov %s1067_s9 }
 0x263   : > { %s1205_s15 = smov %s1051_s23  ;;  %19 = sbr.rel (!%p17_p1) target bundleno = 6 (0x6), region = 85 }
 0x26a   :  { %487 = vsyncpa [#allocation3], 1 }
 0x26b   :  { %489 = vsyncpa [#allocation3 + $0x1], 1 }
 0x26c   :  { %490 = vsyncpa [#allocation6], 1 }
 0x26d   :  { %491 = vsyncpa [#allocation4], 1 }
 0x26e   :  { %493 = vsyncpa [#allocation4 + $0x1], 1 }

</bundles_post_ra>
